<compile_context>
chip_gen: v7x
topology: tpu7x:2x2x1
jax: 0.10.0
libtpu: 0.0.40
codegen_flags: <defaults>
</compile_context>

<pallas_src>
import functools

import jax
import jax.numpy as jnp
from jax.experimental import pallas as pl
from jax.experimental.pallas import tpu as pltpu


def _label_smoothing_kernel(pred_ref, tgt_ref, w_ref, out_ref, *,
                            confidence, off_value, n_rows, block_rows,
                            unit_weight):
    """pred_ref: (Bt, C) logits block; tgt_ref: (Bt, 1) int32 targets;
    w_ref: (1, C) f32 class weights; out_ref: (1, 1, 1) per-block loss sum."""
    i = pl.program_id(0)
    x = pred_ref[...].astype(jnp.float32)                       # (Bt, C)
    t = tgt_ref[...]                                            # (Bt, 1)

    # Numerically stable log-sum-exp along the class (lane) axis.
    m = jnp.max(x, axis=1, keepdims=True)                       # (Bt, 1)
    z = x - m
    lse = jnp.log(jnp.sum(jnp.exp(z), axis=1, keepdims=True))   # (Bt, 1)

    # One-hot of the target, built in-register (no scatter).
    cls = jax.lax.broadcasted_iota(jnp.int32, x.shape, 1)       # (Bt, C)
    onehot = cls == t                                           # (Bt, C)

    if unit_weight:
        # weight=None path: w ≡ 1, so Σw = C, w[t] = 1, w·z = z.
        sum_w = jnp.float32(x.shape[1])
        sum_wz = jnp.sum(z, axis=1, keepdims=True)              # (Bt, 1)
        w_t = jnp.float32(1.0)
        wz_t = jnp.sum(jnp.where(onehot, z, 0.0), axis=1, keepdims=True)
    else:
        w = w_ref[...].astype(jnp.float32)                      # (1, C)
        wb = jnp.broadcast_to(w, x.shape)                       # (Bt, C)
        wz = z * wb                                             # (Bt, C)
        sum_w = jnp.sum(w)                                      # scalar
        sum_wz = jnp.sum(wz, axis=1, keepdims=True)             # (Bt, 1)
        w_t = jnp.sum(jnp.where(onehot, wb, 0.0), axis=1, keepdims=True)
        wz_t = jnp.sum(jnp.where(onehot, wz, 0.0), axis=1, keepdims=True)

    # loss_row = Σ_c -td_c * logp_c with td_c = w_c*(off + (conf-off)*[c==t])
    #          = off*(lse*Σw − Σ w·z) + (conf−off)*(lse*w[t] − (w·z)[t])
    row_loss = (off_value * (lse * sum_w - sum_wz)
                + (confidence - off_value) * (lse * w_t - wz_t))  # (Bt, 1)

    # Ragged-tail mask: rows >= N of a partial last block hold undefined VMEM
    # data (possibly NaN/Inf), so use where — not multiply-by-zero.
    row_ids = i * block_rows + jax.lax.broadcasted_iota(
        jnp.int32, row_loss.shape, 0)
    row_loss = jnp.where(row_ids < n_rows, row_loss, 0.0)

    out_ref[...] = jnp.sum(row_loss, axis=0, keepdims=True).reshape(1, 1, 1)


def _choose_block_rows(n, c):
    """Row-block size: ~3 MiB of f32 work-set, multiple of 8, >=2 grid steps
    whenever possible so both TensorCores (v7x megacore) get work."""
    target_elems = (3 * 1024 * 1024) // 4
    bt = max(8, (target_elems // max(1, c)) // 8 * 8)
    n8 = ((n + 7) // 8) * 8
    bt = min(bt, n8)
    if bt >= n and n > 8:
        bt = (((n + 1) // 2) + 7) // 8 * 8   # split into ~2 balanced blocks
    return bt


def label_smoothing_loss(pred, target, classes, smoothing=0.1, weight=None,
                         block_rows=None):
    """pred: (N, C) logits (f32 or bf16 — passed to the kernel untouched);
    target: (N,) int labels. Returns the scalar smoothed CE loss."""
    N, C = pred.shape
    assert C == classes
    assert classes > 1, "label smoothing requires classes > 1"
    confidence = 1.0 - smoothing
    off_value = smoothing / (classes - 1)

    unit_weight = weight is None
    if unit_weight:
        w2d = jnp.ones((1, C), dtype=jnp.float32)
    else:
        w2d = jnp.asarray(weight, dtype=jnp.float32).reshape(1, C)

    bt = block_rows or _choose_block_rows(N, C)
    n_blocks = pl.cdiv(N, bt)

    tgt2d = target.astype(jnp.int32).reshape(N, 1)

    # VMEM residency: 2x double-buffered logits block + ~6 block-sized f32
    # intermediates + headroom, capped to stay comfortably inside v7x VMEM.
    elems = bt * C
    in_block_bytes = elems * pred.dtype.itemsize
    vmem_limit = 2 * in_block_bytes + 6 * elems * 4 + 2 * 1024 * 1024
    vmem_limit = int(min(30 * 1024 * 1024, max(4 * 1024 * 1024, vmem_limit)))

    kernel = functools.partial(
        _label_smoothing_kernel,
        confidence=float(confidence), off_value=float(off_value),
        n_rows=N, block_rows=bt, unit_weight=unit_weight)

    block_sums = pl.pallas_call(
        kernel,
        out_shape=jax.ShapeDtypeStruct((n_blocks, 1, 1), jnp.float32),
        grid_spec=pltpu.PrefetchScalarGridSpec(
            num_scalar_prefetch=0,
            grid=(n_blocks,),
            in_specs=[
                pl.BlockSpec((bt, C), lambda i: (i, 0)),   # logits block
                pl.BlockSpec((bt, 1), lambda i: (i, 0)),   # targets block
                pl.BlockSpec((1, C), lambda i: (0, 0)),    # class weights
            ],
            out_specs=pl.BlockSpec((1, 1, 1), lambda i: (i, 0, 0)),
        ),
        compiler_params=pltpu.CompilerParams(
            dimension_semantics=("parallel",),
            vmem_limit_bytes=vmem_limit,
        ),
    )(pred, tgt2d, w2d)

    # torch.mean(torch.sum(..., dim=-1)) == (sum of per-row losses) / N.
    return jnp.sum(block_sums) / N


def label_smoothing_loss_ref(pred, target, classes, smoothing=0.1, weight=None):
    """Pure-JAX reference matching the PyTorch forward exactly."""
    logp = jax.nn.log_softmax(pred.astype(jnp.float32), axis=-1)
    off = smoothing / (classes - 1)
    td = jnp.full_like(logp, off)
    td = td.at[jnp.arange(pred.shape[0]), target].set(1.0 - smoothing)
    if weight is not None:
        td = td * jnp.asarray(weight, jnp.float32)[None, :]
    return jnp.mean(jnp.sum(-td * logp, axis=-1))


if __name__ == "__main__":
    C = 10
    smoothing = 0.1
    key = jax.random.PRNGKey(0)
    kp, kt, kw, kp2, kt2 = jax.random.split(key, 5)

    # Case 1: N multiple of the 8-row block, no class weights (unit-weight
    # fast path), 2-block grid.
    N = 16
    pred = jax.random.normal(kp, (N, C), dtype=jnp.float32) * 2.0
    target = jax.random.randint(kt, (N,), 0, C, dtype=jnp.int32)
    out = jax.block_until_ready(label_smoothing_loss(pred, target, C, smoothing))
    ref = label_smoothing_loss_ref(pred, target, C, smoothing)
    assert jnp.allclose(out, ref, atol=1e-4, rtol=1e-5), "mismatch (no weight)"

    # Case 2: ragged N (not a multiple of 8) + class weights — exercises the
    # in-kernel tail mask and the weighted path.
    N2 = 13
    pred2 = jax.random.normal(kp2, (N2, C), dtype=jnp.float32) * 2.0
    target2 = jax.random.randint(kt2, (N2,), 0, C, dtype=jnp.int32)
    weight = jax.random.uniform(kw, (C,), dtype=jnp.float32) + 0.5
    out2 = jax.block_until_ready(
        label_smoothing_loss(pred2, target2, C, smoothing, weight=weight))
    ref2 = label_smoothing_loss_ref(pred2, target2, C, smoothing, weight=weight)
    assert jnp.allclose(out2, ref2, atol=1e-4, rtol=1e-5), "mismatch (weighted)"

    print("KERNEL_OK")
</pallas_src>

<mosaic_0001>
module attributes {stable_mosaic.version = 11 : i64} {
  func.func @_label_smoothing_kernel(%arg0: i32, %arg1: memref<8x10xf32, #tpu.memory_space<vmem>>, %arg2: memref<8x1xi32, #tpu.memory_space<vmem>>, %arg3: memref<1x10xf32, #tpu.memory_space<vmem>>, %arg4: memref<1x1x1xf32, #tpu.memory_space<vmem>>) attributes {dimension_semantics = [#tpu.dimension_semantics<parallel>], iteration_bounds = array<i64: 2>, scalar_prefetch = 0 : i64, scratch_operands = 0 : i64, tpu.core_type = #tpu.core_type<tc>, window_params = [{transform_indices = @transform_0, window_bounds = array<i64: 8, 10>}, {transform_indices = @transform_1, window_bounds = array<i64: 8, 1>}, {pipeline_mode = #tpu.pipeline_mode<synchronous>, transform_indices = @transform_2, window_bounds = array<i64: 1, 10>}, {transform_indices = @transform_3, window_bounds = array<i64: 1, 1, 1>}]} {
    %c0 = arith.constant 0 : index
    %c0_0 = arith.constant 0 : index
    %0 = vector.load %arg1[%c0, %c0_0] : memref<8x10xf32, #tpu.memory_space<vmem>>, vector<8x10xf32>
    %c0_1 = arith.constant 0 : index
    %c0_2 = arith.constant 0 : index
    %1 = vector.load %arg2[%c0_1, %c0_2] : memref<8x1xi32, #tpu.memory_space<vmem>>, vector<8x1xi32>
    %cst = arith.constant dense<0xFF800000> : vector<8xf32>
    %2 = vector.multi_reduction <maximumf>, %0, %cst [1] : vector<8x10xf32> to vector<8xf32>
    %3 = vector.shape_cast %2 : vector<8xf32> to vector<8x1xf32>
    %4 = vector.broadcast %3 : vector<8x1xf32> to vector<8x10xf32>
    %5 = arith.subf %0, %4 : vector<8x10xf32>
    %6 = math.exp %5 : vector<8x10xf32>
    %cst_3 = arith.constant dense<0.000000e+00> : vector<8xf32>
    %7 = vector.multi_reduction <add>, %6, %cst_3 [1] : vector<8x10xf32> to vector<8xf32>
    %8 = vector.shape_cast %7 : vector<8xf32> to vector<8x1xf32>
    %9 = math.log %8 : vector<8x1xf32>
    %10 = tpu.iota {dimensions = array<i32: 1>} : vector<8x10xi32>
    %11 = vector.broadcast %1 : vector<8x1xi32> to vector<8x10xi32>
    %12 = arith.cmpi eq, %10, %11 : vector<8x10xi32>
    %cst_4 = arith.constant dense<0.000000e+00> : vector<8xf32>
    %13 = vector.multi_reduction <add>, %5, %cst_4 [1] : vector<8x10xf32> to vector<8xf32>
    %14 = vector.shape_cast %13 : vector<8xf32> to vector<8x1xf32>
    %cst_5 = arith.constant 0.000000e+00 : f32
    %15 = vector.broadcast %cst_5 : f32 to vector<8x10xf32>
    %16 = arith.select %12, %5, %15 : vector<8x10xi1>, vector<8x10xf32>
    %cst_6 = arith.constant dense<0.000000e+00> : vector<8xf32>
    %17 = vector.multi_reduction <add>, %16, %cst_6 [1] : vector<8x10xf32> to vector<8xf32>
    %18 = vector.shape_cast %17 : vector<8xf32> to vector<8x1xf32>
    %cst_7 = arith.constant 1.000000e+01 : f32
    %19 = vector.broadcast %cst_7 : f32 to vector<8x1xf32>
    %20 = arith.mulf %9, %19 : vector<8x1xf32>
    %21 = arith.subf %20, %14 : vector<8x1xf32>
    %cst_8 = arith.constant 0.0111111114 : f32
    %22 = vector.broadcast %cst_8 : f32 to vector<8x1xf32>
    %23 = arith.mulf %22, %21 : vector<8x1xf32>
    %cst_9 = arith.constant 1.000000e+00 : f32
    %24 = vector.broadcast %cst_9 : f32 to vector<8x1xf32>
    %25 = arith.mulf %9, %24 : vector<8x1xf32>
    %26 = arith.subf %25, %18 : vector<8x1xf32>
    %cst_10 = arith.constant 0.888888895 : f32
    %27 = vector.broadcast %cst_10 : f32 to vector<8x1xf32>
    %28 = arith.mulf %27, %26 : vector<8x1xf32>
    %29 = arith.addf %23, %28 : vector<8x1xf32>
    %c8_i32 = arith.constant 8 : i32
    %30 = arith.muli %arg0, %c8_i32 : i32
    %31 = tpu.iota {dimensions = array<i32: 0>} : vector<8x1xi32>
    %32 = vector.broadcast %30 : i32 to vector<8x1xi32>
    %33 = arith.addi %32, %31 : vector<8x1xi32>
    %c16_i32 = arith.constant 16 : i32
    %34 = vector.broadcast %c16_i32 : i32 to vector<8x1xi32>
    %35 = arith.cmpi slt, %33, %34 : vector<8x1xi32>
    %cst_11 = arith.constant 0.000000e+00 : f32
    %36 = vector.broadcast %cst_11 : f32 to vector<8x1xf32>
    %37 = arith.select %35, %29, %36 : vector<8x1xi1>, vector<8x1xf32>
    %cst_12 = arith.constant dense<0.000000e+00> : vector<1xf32>
    %38 = vector.multi_reduction <add>, %37, %cst_12 [0] : vector<8x1xf32> to vector<1xf32>
    %39 = vector.shape_cast %38 : vector<1xf32> to vector<1x1xf32>
    %40 = vector.shape_cast %39 : vector<1x1xf32> to vector<1x1x1xf32>
    %c0_13 = arith.constant 0 : index
    %c0_14 = arith.constant 0 : index
    %c0_15 = arith.constant 0 : index
    %41 = vector.load %arg4[%c0_13, %c0_14, %c0_15] : memref<1x1x1xf32, #tpu.memory_space<vmem>>, vector<1x1x1xf32>
    tpu.vector_store %arg4[%c0_13, %c0_14, %c0_15], %40 {strides = array<i32>} : memref<1x1x1xf32, #tpu.memory_space<vmem>>, vector<1x1x1xf32>,
    return
  }
  func.func @transform_0(%arg0: i32) -> (i32, i32) {
    %c0_i32 = arith.constant 0 : i32
    %c0_i32_0 = arith.constant 0 : i32
    return %arg0, %c0_i32 : i32, i32
  }
  func.func @transform_1(%arg0: i32) -> (i32, i32) {
    %c0_i32 = arith.constant 0 : i32
    %c0_i32_0 = arith.constant 0 : i32
    return %arg0, %c0_i32 : i32, i32
  }
  func.func @transform_2(%arg0: i32) -> (i32, i32) {
    %c0_i32 = arith.constant 0 : i32
    %c0_i32_0 = arith.constant 0 : i32
    %c0_i32_1 = arith.constant 0 : i32
    return %c0_i32, %c0_i32_0 : i32, i32
  }
  func.func @transform_3(%arg0: i32) -> (i32, i32, i32) {
    %c0_i32 = arith.constant 0 : i32
    %c0_i32_0 = arith.constant 0 : i32
    %c0_i32_1 = arith.constant 0 : i32
    return %arg0, %c0_i32, %c0_i32_0 : i32, i32, i32
  }
}

</mosaic_0001>

<bundles_post_ra>
// kernel: tpu_custom_call.1
= control target key start
LH: loop header
LB: loop body
LE: loop exit
PB: predicated region body
PF: predicated region fallthrough
CT: control target
= control target key end

     0   :  { %s341_s12 = smov 0   ;;  %s374_s0 = inlined_call_operand.vmem [shape: f32[16,10], index: 0, kind: input, shape index: {}]   ;;  %s375_s1 = inlined_call_operand.vmem [shape: s32[16,1], index: 1, kind: input, shape index: {}]   ;;  %s376_s2 = inlined_call_operand.vmem [shape: f32[1,10], index: 2, kind: input, shape index: {}]   ;;  %s377_s3 = inlined_call_operand.vmem [shape: f32[2,1,1], index: 3, kind: output, shape index: {}]  }
   0x1 LB: > { %s347_s13 = sadd.s32 4294967295, %s318_s12   ;;  %p292_p0 = scmp.ge.s32.totalorder %s318_s12, 1  ;;  %s318_s12 = sphi %s341_s12, %s13_s12  }
   0x2   : > { %p145_p1 = scmp.lt.s32.totalorder %s318_s12, 3 }
   0x4   : > { %p146_p2 = pnand %p292_p0, %p145_p1 }
   0x5   : > { %p170_p3 = scmp.lt.s32.totalorder (!%p146_p2), %s347_s13, 1  ;;  %v320_v0 = vmov (!%p146_p2), 0   ;;  %vm183_vm0 = vcmask (!%p146_p2), 80896   ;;  %v195_v7 = vlaneseq (!%p146_p2)  ;;  %s295_s21 = sshll.u32 (!%p146_p2), %s347_s13, 3  ;;  %vm227_vm3 = vcmask (!%p146_p2), 0  }
   0x6   : > { %149 = sbr.rel (%p146_p2) target bundleno = 354 (0x162), region = 32  ;;  %307 = vset.pattern.permute.xlu0 (!%p146_p2), %v320_v0  ;;  %v217_v20 = vstv (!%p146_p2), %s295_s21 }
   0x7   : > { %v196_v8 = vand.u32 (!%p146_p2), 127, %v195_v7  ;;  %v216_v18 = vshrl.u32 (!%p146_p2), %v195_v7, 7 }
   0x9   : > { %v218_v24 = vadd.s32 (!%p146_p2), %v217_v20, %v216_v18 }
   0xb   : > { %vm219_vm2 = vcmp.lt.s32.totalorder (!%p146_p2), %v218_v24, 16 }
   0xd   : > { %s353_s2 = scalar_select %p170_p3, %s347_s13, 1 }
   0xf   : > { %s293_s14 = sshll.u32 %s353_s2, 3  ;;  %s180_s24 = scalar_lea.vmem %s377_s3, %s353_s2 }
  0x10   : > { %s173_s17 = scalar_lea.vmem %s374_s0, %s293_s14  ;;  %s177_s20 = scalar_lea.vmem %s375_s1, %s293_s14 }
  0x11   : > { %v181_v1 = vld [vmem:[%s173_s17] sm:$0xff] }
  0x12   : > { %v184_v2 = vsel %vm183_vm0, %v181_v1, -inf  ;;  %v182_v3 = vld [vmem:[%s177_s20] sm:$0xff] }
  0x13   : > { %185 = vmax.xlane.f32.xlu0 %v184_v2 }
  0x29   : > { %198 = vperm.xlu0 %307, %v182_v3  }
  0xa0   : > { %v186_v4 = vpop.xlane.xlu0 %185 }
  0xa1   : > { %v187_v5 = vsub.f32 %v181_v1, %v186_v4 }
  0xa3   : > { %v188_v6 = vmul.f32 1.442695, %v187_v5  ;;  %v201_v12 = vsel %vm183_vm0, %v187_v5, 0.0 }
  0xa5   : > { %308 = vpow2.f32 %v188_v6 }
  0xa8   : > { %v199_v10 = vpop.permute.xlu0 %198 }
  0xa9   : > { %vm200_vm1 = vcmp.eq.s32.totalorder %v196_v8, %v199_v10 }
  0xaa   : > { %v204_v13 = vsel %vm200_vm1, %v187_v5, 0.0 }
  0xab   : > { %v205_v14 = vsel %vm183_vm0, %v204_v13, 0.0 }
  0xaf   : > { %v309_v9 = vpop.eup %308 }
  0xb0   : > { %v190_v11 = vsel %vm183_vm0, %v309_v9, 0.0 }
  0xb1   : > { %191 = vadd.xlane.f32.xlu1 %v190_v11 }
  0xb5   : > { %202 = vadd.xlane.f32.xlu1 %v201_v12 }
  0xb9   : > { %206 = vadd.xlane.f32.xlu1 %v205_v14 }
 0x13e   : > { %v192_v15 = vpop.xlane.xlu1 %191 }
 0x13f   : > { %310 = vlog2.f32 %v192_v15 }
 0x142   : > { %v203_v16 = vpop.xlane.xlu1 %202 }
 0x146   : > { %v207_v21 = vpop.xlane.xlu1 %206 }
 0x149   : > { %v311_v17 = vpop.eup %310 }
 0x14a   : > { %v194_v19 = vmul.f32 0.6931472, %v311_v17 }
 0x14c   : > { %v208_v22 = vmul.f32 10.0, %v194_v19  ;;  %v211_v23 = vsub.f32 %v194_v19, %v207_v21 }
 0x14e   : > { %v209_v25 = vsub.f32 %v208_v22, %v203_v16  ;;  %v212_v27 = vmul.f32 0.8888889, %v211_v23 }
 0x150   : > { %v210_v26 = vmul.f32 0.011111111, %v209_v25 }
 0x152   : > { %v213_v28 = vadd.f32 %v212_v27, %v210_v26 }
 0x154   : > { %v220_v29 = vsel %vm219_vm2, %v213_v28, 0.0 }
 0x155   : > { %v221_v30 = vrot.slane %v220_v29, 4 }
 0x157   : > { %v222_v31 = vadd.f32 %v221_v30, %v220_v29 }
 0x159   : > { %v223_v32 = vrot.slane %v222_v31, 2 }
 0x15b   : > { %v224_v33 = vadd.f32 %v223_v32, %v222_v31 }
 0x15d   : > { %v225_v34 = vrot.slane %v224_v33, 1 }
 0x15f   : > { %v226_v35 = vadd.f32 %v225_v34, %v224_v33 }
 0x161   : > { %228 = vst.msk [vmem:[%s180_s24] sm:$0x1] %vm227_vm3, %v226_v35 }
 0x162 PF: > { %s13_s12 = sadd.s32 1, %s318_s12  }
 0x163   : > { %p10_p4 = scmp.ge.s32.totalorder %s13_s12, 4  }
 0x165   :  { %12 = sbr.rel (!%p10_p4) target bundleno = 1 (0x1), region = 65 }

</bundles_post_ra>
